<compile_context>
chip_gen: v7x
topology: tpu7x:2x2x1
jax: 0.10.0
libtpu: 0.0.40
codegen_flags: <defaults>
</compile_context>

<pallas_src>
import functools

import jax
import jax.numpy as jnp
from jax.experimental import pallas as pl
from jax.experimental.pallas import tpu as pltpu


def _round_up(x, m):
    return ((x + m - 1) // m) * m


# ---------------------------------------------------------------------------
# Pallas kernel (K-major: channels on sublanes, positions on lanes)
# ---------------------------------------------------------------------------
def _fcos_decode_kernel(cls_ref, ctr_ref, reg_ref, loc_ref,
                        scores_ref, boxes_ref, *, pre_nms_thresh, tp, p_valid):
    # cls_ref:  (1, C, tp)   classification logits
    # ctr_ref:  (1, 1, tp)   centerness logits
    # reg_ref:  (1, 4, tp)   box regression rows (l, t, r, b)
    # loc_ref:  (2, tp)      anchor-point locations rows (x, y)
    cls = cls_ref[0].astype(jnp.float32)     # (C, tp)
    ctr = ctr_ref[0].astype(jnp.float32)     # (1, tp)
    reg = reg_ref[0].astype(jnp.float32)     # (4, tp)
    loc = loc_ref[...].astype(jnp.float32)   # (2, tp)

    # Global position index along the lane axis -> mask padded positions.
    p_block = pl.program_id(0)               # grid = (P_pad // tp, N)
    pos = p_block * tp + jax.lax.broadcasted_iota(jnp.int32, (1, tp), 1)
    in_range = pos < p_valid                 # (1, tp), broadcasts over classes

    cls_sig = jax.nn.sigmoid(cls)
    ctr_sig = jax.nn.sigmoid(ctr)

    joint = cls_sig * ctr_sig                # (1,tp) broadcast -> (C,tp)
    score = jnp.sqrt(joint)                  # sqrt(per_box_cls)
    candidate = (cls_sig > jnp.float32(pre_nms_thresh)) & in_range
    # -1 sentinel marks non-candidates / padding (valid scores are > 0)
    scores_ref[0] = jnp.where(candidate, score,
                              jnp.float32(-1.0)).astype(scores_ref.dtype)

    # Box decode: [x - l, y - t, x + r, y + b], all full-lane-width rows.
    x = loc[0:1, :]
    y = loc[1:2, :]
    l = reg[0:1, :]
    t = reg[1:2, :]
    r = reg[2:3, :]
    b = reg[3:4, :]
    boxes = jnp.concatenate([x - l, y - t, x + r, y + b], axis=0)   # (4, tp)
    boxes_ref[0] = boxes.astype(boxes_ref.dtype)


def fcos_decode(cls_nkp, ctr_nkp, reg_nkp, loc_kp, pre_nms_thresh,
                tp_max=2048, out_dtype=jnp.float32):
    """Dense score/box decode on TPU, K-major layout.

    cls_nkp: (N, C, P), ctr_nkp: (N, 1, P), reg_nkp: (N, 4, P), loc_kp: (2, P).
    Returns scores (N, C, P_pad) and boxes (N, 4, P_pad) where P_pad rounds P
    up to a multiple of the position tile; padded positions carry the -1
    sentinel score.
    """
    N, C, P = cls_nkp.shape

    # Lane-dense tile on the position axis: multiple of 128, up to tp_max.
    tp = min(_round_up(int(tp_max), 128), _round_up(P, 128))
    p_pad_total = _round_up(P, tp)

    if p_pad_total != P:
        pad = p_pad_total - P
        cls_nkp = jnp.pad(cls_nkp, ((0, 0), (0, 0), (0, pad)))
        ctr_nkp = jnp.pad(ctr_nkp, ((0, 0), (0, 0), (0, pad)))
        reg_nkp = jnp.pad(reg_nkp, ((0, 0), (0, 0), (0, pad)))
        loc_kp = jnp.pad(loc_kp, ((0, 0), (0, pad)))

    kernel = functools.partial(_fcos_decode_kernel,
                               pre_nms_thresh=float(pre_nms_thresh),
                               tp=tp, p_valid=P)

    in_bytes = (cls_nkp.size * cls_nkp.dtype.itemsize
                + ctr_nkp.size * ctr_nkp.dtype.itemsize
                + reg_nkp.size * reg_nkp.dtype.itemsize
                + loc_kp.size * loc_kp.dtype.itemsize)
    out_bytes = (N * C * p_pad_total + N * 4 * p_pad_total) * jnp.dtype(out_dtype).itemsize
    cost = pl.CostEstimate(
        flops=int(3 * N * p_pad_total * C),
        transcendentals=int(N * p_pad_total * (C + 1)),
        bytes_accessed=int(in_bytes + out_bytes),
    )

    scores, boxes = pl.pallas_call(
        kernel,
        out_shape=(
            jax.ShapeDtypeStruct((N, C, p_pad_total), out_dtype),
            jax.ShapeDtypeStruct((N, 4, p_pad_total), out_dtype),
        ),
        grid_spec=pltpu.PrefetchScalarGridSpec(
            num_scalar_prefetch=0,
            # n is the inner axis: the loc block index is unchanged across
            # consecutive image steps, so its DMA is skipped.
            grid=(p_pad_total // tp, N),
            in_specs=[
                pl.BlockSpec((1, C, tp), lambda p, n: (n, 0, p)),
                pl.BlockSpec((1, 1, tp), lambda p, n: (n, 0, p)),
                pl.BlockSpec((1, 4, tp), lambda p, n: (n, 0, p)),
                pl.BlockSpec((2, tp), lambda p, n: (0, p)),
            ],
            out_specs=[
                pl.BlockSpec((1, C, tp), lambda p, n: (n, 0, p)),
                pl.BlockSpec((1, 4, tp), lambda p, n: (n, 0, p)),
            ],
        ),
        compiler_params=pltpu.CompilerParams(
            dimension_semantics=("parallel", "parallel")),
        cost_estimate=cost,
    )(cls_nkp, ctr_nkp, reg_nkp, loc_kp)
    return scores, boxes


# ---------------------------------------------------------------------------
# Plain-JAX glue (reshapes, top-k selection, per-image packaging)
# ---------------------------------------------------------------------------
def permute_to_N_K_HW(t, K):
    """(N, K, H, W) -> (N, K, H*W).  K-major: no transpose needed."""
    N = t.shape[0]
    return t.reshape(N, K, -1)


def compute_locations(h, w, stride):
    """FCOS anchor-point locations for one level: (H*W, 2) of (x, y)."""
    shifts_x = jnp.arange(w, dtype=jnp.float32) * stride + stride // 2
    shifts_y = jnp.arange(h, dtype=jnp.float32) * stride + stride // 2
    sy, sx = jnp.meshgrid(shifts_y, shifts_x, indexing="ij")
    return jnp.stack([sx.reshape(-1), sy.reshape(-1)], axis=-1)


class FCOSPostProcessorPallas:
    def __init__(self, pre_nms_thresh, pre_nms_top_n, nms_thresh,
                 fpn_post_nms_top_n, min_size, num_classes,
                 bbox_aug_enabled=False):
        self.pre_nms_thresh = float(pre_nms_thresh)
        self.pre_nms_top_n = int(pre_nms_top_n)
        self.nms_thresh = float(nms_thresh)
        self.fpn_post_nms_top_n = int(fpn_post_nms_top_n)
        self.min_size = min_size
        self.num_classes = int(num_classes)
        self.bbox_aug_enabled = bbox_aug_enabled

    def __call__(self, locations, box_cls, box_regression, centerness,
                 image_sizes):
        num_classes = 80  # hard-coded in the reference forward()
        # K-major glue: reshape only (no NCHW transpose), concat levels on P.
        cls = jnp.concatenate(
            [permute_to_N_K_HW(x, num_classes) for x in box_cls], axis=2)
        reg = jnp.concatenate(
            [permute_to_N_K_HW(x, 4) for x in box_regression], axis=2)
        ctr = jnp.concatenate(
            [permute_to_N_K_HW(x, 1) for x in centerness], axis=2)
        loc = jnp.concatenate(
            [jnp.transpose(l, (1, 0)) for l in locations], axis=1)   # (2, P)

        level_sizes = [int(l.shape[0]) for l in locations]           # H*W per level

        # Hot path on TPU: sigmoid / joint score / threshold mask / box decode.
        # TODO(synk): fuse the per-level pre_nms_top_n candidate selection into
        # the kernel (or a second Pallas pass) to avoid re-reading the dense
        # (N, C, P) scores for top_k.
        scores_dense, boxes_dense = fcos_decode(
            cls, ctr, reg, loc, self.pre_nms_thresh)

        N, C = cls.shape[0], num_classes
        results = []
        for img in range(N):
            boxes_lvls, scores_lvls, classes_lvls, valid_lvls = [], [], [], []
            off = 0
            for lvl_size in level_sizes:
                s = scores_dense[img, :, off:off + lvl_size]          # (C, Pl)
                b = boxes_dense[img, :, off:off + lvl_size]           # (4, Pl)
                flat = s.reshape(-1)                                  # class-major
                k = min(self.pre_nms_top_n, flat.shape[0])
                top_scores, top_idx = jax.lax.top_k(flat, k)          # fixed-size top-k
                valid = top_scores > 0.0                              # sentinel filter
                cls_idx = top_idx // lvl_size
                loc_idx = top_idx % lvl_size
                boxes_lvls.append(jnp.transpose(b[:, loc_idx], (1, 0)))  # (k, 4)
                scores_lvls.append(jnp.where(valid, top_scores, 0.0))
                classes_lvls.append(cls_idx)
                valid_lvls.append(valid)
                off += lvl_size

            boxes_all = jnp.concatenate(boxes_lvls, axis=0)
            scores_all = jnp.concatenate(scores_lvls, axis=0)
            classes_all = jnp.concatenate(classes_lvls, axis=0)
            valid_all = jnp.concatenate(valid_lvls, axis=0)

            # TODO(synk): batched_nms + Instances/Boxes construction (dynamic
            # shapes, sequential suppression) have no clean Pallas equivalent;
            # returning padded pre-NMS candidates with a validity mask instead.
            results.append({
                "image_size": image_sizes[img],
                "pred_boxes": boxes_all,
                "scores": scores_all,
                "pred_classes": classes_all,
                "valid": valid_all,
            })
        return results


# ---------------------------------------------------------------------------
# Example run
# ---------------------------------------------------------------------------
if __name__ == "__main__":
    key = jax.random.PRNGKey(0)
    N = 2
    C = 80
    # (H, W, stride) per FPN level — small, P = 64 + 16 = 80 positions total.
    level_shapes = [(8, 8, 8), (4, 4, 16)]

    keys = jax.random.split(key, 3 * len(level_shapes))
    box_cls, box_reg, ctrness, locations = [], [], [], []
    for li, (h, w, s) in enumerate(level_shapes):
        k1, k2, k3 = keys[3 * li], keys[3 * li + 1], keys[3 * li + 2]
        box_cls.append(jax.random.normal(k1, (N, C, h, w), jnp.float32))
        box_reg.append(jax.random.uniform(k2, (N, 4, h, w), jnp.float32) * 8.0)
        ctrness.append(jax.random.normal(k3, (N, 1, h, w), jnp.float32))
        locations.append(compute_locations(h, w, s))

    post = FCOSPostProcessorPallas(
        pre_nms_thresh=0.3,
        pre_nms_top_n=50,
        nms_thresh=0.6,
        fpn_post_nms_top_n=20,
        min_size=0,
        num_classes=C,
    )

    results = post(locations, box_cls, box_reg, ctrness,
                   image_sizes=[(64, 64)] * N)

    for r in results:
        jax.block_until_ready(r["pred_boxes"])
        jax.block_until_ready(r["scores"])
        jax.block_until_ready(r["pred_classes"])

    print("KERNEL_OK")
</pallas_src>

<mosaic_0001>
module attributes {stable_mosaic.version = 11 : i64} {
  func.func @_fcos_decode_kernel(%arg0: i32, %arg1: i32, %arg2: memref<1x80x128xf32, #tpu.memory_space<vmem>>, %arg3: memref<1x1x128xf32, #tpu.memory_space<vmem>>, %arg4: memref<1x4x128xf32, #tpu.memory_space<vmem>>, %arg5: memref<2x128xf32, #tpu.memory_space<vmem>>, %arg6: memref<1x80x128xf32, #tpu.memory_space<vmem>>, %arg7: memref<1x4x128xf32, #tpu.memory_space<vmem>>) attributes {dimension_semantics = [#tpu.dimension_semantics<parallel>, #tpu.dimension_semantics<parallel>], iteration_bounds = array<i64: 1, 2>, scalar_prefetch = 0 : i64, scratch_operands = 0 : i64, tpu.core_type = #tpu.core_type<tc>, window_params = [{transform_indices = @transform_0, window_bounds = array<i64: 1, 80, 128>}, {transform_indices = @transform_1, window_bounds = array<i64: 1, 1, 128>}, {transform_indices = @transform_2, window_bounds = array<i64: 1, 4, 128>}, {transform_indices = @transform_3, window_bounds = array<i64: 2, 128>}, {transform_indices = @transform_4, window_bounds = array<i64: 1, 80, 128>}, {transform_indices = @transform_5, window_bounds = array<i64: 1, 4, 128>}]} {
    %c0 = arith.constant 0 : index
    %c0_0 = arith.constant 0 : index
    %c0_1 = arith.constant 0 : index
    %0 = vector.load %arg2[%c0, %c0_0, %c0_1] : memref<1x80x128xf32, #tpu.memory_space<vmem>>, vector<1x80x128xf32>
    %1 = vector.shape_cast %0 : vector<1x80x128xf32> to vector<80x128xf32>
    %c0_2 = arith.constant 0 : index
    %c0_3 = arith.constant 0 : index
    %c0_4 = arith.constant 0 : index
    %2 = vector.load %arg3[%c0_2, %c0_3, %c0_4] : memref<1x1x128xf32, #tpu.memory_space<vmem>>, vector<1x1x128xf32>
    %3 = vector.shape_cast %2 : vector<1x1x128xf32> to vector<1x128xf32>
    %c0_5 = arith.constant 0 : index
    %c0_6 = arith.constant 0 : index
    %c0_7 = arith.constant 0 : index
    %4 = vector.load %arg4[%c0_5, %c0_6, %c0_7] : memref<1x4x128xf32, #tpu.memory_space<vmem>>, vector<1x4x128xf32>
    %5 = vector.shape_cast %4 : vector<1x4x128xf32> to vector<4x128xf32>
    %c0_8 = arith.constant 0 : index
    %c0_9 = arith.constant 0 : index
    %6 = vector.load %arg5[%c0_8, %c0_9] : memref<2x128xf32, #tpu.memory_space<vmem>>, vector<2x128xf32>
    %c128_i32 = arith.constant 128 : i32
    %7 = arith.muli %arg0, %c128_i32 : i32
    %8 = tpu.iota {dimensions = array<i32: 1>} : vector<1x128xi32>
    %9 = vector.broadcast %7 : i32 to vector<1x128xi32>
    %10 = arith.addi %9, %8 : vector<1x128xi32>
    %c80_i32 = arith.constant 80 : i32
    %11 = vector.broadcast %c80_i32 : i32 to vector<1x128xi32>
    %12 = arith.cmpi slt, %10, %11 : vector<1x128xi32>
    %13 = arith.negf %1 : vector<80x128xf32>
    %14 = math.exp %13 : vector<80x128xf32>
    %cst = arith.constant 1.000000e+00 : f32
    %15 = vector.broadcast %cst : f32 to vector<80x128xf32>
    %16 = arith.addf %15, %14 : vector<80x128xf32>
    %17 = arith.divf %15, %16 : vector<80x128xf32>
    %18 = arith.negf %3 : vector<1x128xf32>
    %19 = math.exp %18 : vector<1x128xf32>
    %cst_10 = arith.constant 1.000000e+00 : f32
    %20 = vector.broadcast %cst_10 : f32 to vector<1x128xf32>
    %21 = arith.addf %20, %19 : vector<1x128xf32>
    %22 = arith.divf %20, %21 : vector<1x128xf32>
    %23 = vector.broadcast %22 : vector<1x128xf32> to vector<80x128xf32>
    %24 = arith.mulf %17, %23 : vector<80x128xf32>
    %25 = math.sqrt %24 : vector<80x128xf32>
    %cst_11 = arith.constant 3.000000e-01 : f32
    %26 = vector.broadcast %cst_11 : f32 to vector<80x128xf32>
    %27 = arith.cmpf ogt, %17, %26 : vector<80x128xf32>
    %28 = vector.broadcast %12 : vector<1x128xi1> to vector<80x128xi1>
    %29 = arith.andi %27, %28 : vector<80x128xi1>
    %cst_12 = arith.constant -1.000000e+00 : f32
    %30 = vector.broadcast %cst_12 : f32 to vector<80x128xf32>
    %31 = arith.select %29, %25, %30 : vector<80x128xi1>, vector<80x128xf32>
    %c0_13 = arith.constant 0 : index
    %c0_14 = arith.constant 0 : index
    %c0_15 = arith.constant 0 : index
    %32 = vector.load %arg6[%c0_13, %c0_14, %c0_15] : memref<1x80x128xf32, #tpu.memory_space<vmem>>, vector<1x80x128xf32>
    %33 = vector.shape_cast %32 : vector<1x80x128xf32> to vector<80x128xf32>
    %34 = vector.shape_cast %31 : vector<80x128xf32> to vector<1x80x128xf32>
    tpu.vector_store %arg6[%c0_13, %c0_14, %c0_15], %34 {strides = array<i32>} : memref<1x80x128xf32, #tpu.memory_space<vmem>>, vector<1x80x128xf32>,
    %35 = vector.extract_strided_slice %6 {offsets = [0, 0], sizes = [1, 128], strides = [1, 1]} : vector<2x128xf32> to vector<1x128xf32>
    %36 = vector.extract_strided_slice %6 {offsets = [1, 0], sizes = [1, 128], strides = [1, 1]} : vector<2x128xf32> to vector<1x128xf32>
    %37 = vector.extract_strided_slice %5 {offsets = [0, 0], sizes = [1, 128], strides = [1, 1]} : vector<4x128xf32> to vector<1x128xf32>
    %38 = vector.extract_strided_slice %5 {offsets = [1, 0], sizes = [1, 128], strides = [1, 1]} : vector<4x128xf32> to vector<1x128xf32>
    %39 = vector.extract_strided_slice %5 {offsets = [2, 0], sizes = [1, 128], strides = [1, 1]} : vector<4x128xf32> to vector<1x128xf32>
    %40 = vector.extract_strided_slice %5 {offsets = [3, 0], sizes = [1, 128], strides = [1, 1]} : vector<4x128xf32> to vector<1x128xf32>
    %41 = arith.subf %35, %37 : vector<1x128xf32>
    %42 = arith.subf %36, %38 : vector<1x128xf32>
    %43 = arith.addf %35, %39 : vector<1x128xf32>
    %44 = arith.addf %36, %40 : vector<1x128xf32>
    %45 = tpu.concatenate %41, %42, %43, %44 in 0 : vector<1x128xf32>, vector<1x128xf32>, vector<1x128xf32>, vector<1x128xf32> -> vector<4x128xf32>
    %c0_16 = arith.constant 0 : index
    %c0_17 = arith.constant 0 : index
    %c0_18 = arith.constant 0 : index
    %46 = vector.load %arg7[%c0_16, %c0_17, %c0_18] : memref<1x4x128xf32, #tpu.memory_space<vmem>>, vector<1x4x128xf32>
    %47 = vector.shape_cast %46 : vector<1x4x128xf32> to vector<4x128xf32>
    %48 = vector.shape_cast %45 : vector<4x128xf32> to vector<1x4x128xf32>
    tpu.vector_store %arg7[%c0_16, %c0_17, %c0_18], %48 {strides = array<i32>} : memref<1x4x128xf32, #tpu.memory_space<vmem>>, vector<1x4x128xf32>,
    return
  }
  func.func @transform_0(%arg0: i32, %arg1: i32) -> (i32, i32, i32) {
    %c0_i32 = arith.constant 0 : i32
    %c0_i32_0 = arith.constant 0 : i32
    return %arg1, %c0_i32, %arg0 : i32, i32, i32
  }
  func.func @transform_1(%arg0: i32, %arg1: i32) -> (i32, i32, i32) {
    %c0_i32 = arith.constant 0 : i32
    %c0_i32_0 = arith.constant 0 : i32
    return %arg1, %c0_i32, %arg0 : i32, i32, i32
  }
  func.func @transform_2(%arg0: i32, %arg1: i32) -> (i32, i32, i32) {
    %c0_i32 = arith.constant 0 : i32
    %c0_i32_0 = arith.constant 0 : i32
    return %arg1, %c0_i32, %arg0 : i32, i32, i32
  }
  func.func @transform_3(%arg0: i32, %arg1: i32) -> (i32, i32) {
    %c0_i32 = arith.constant 0 : i32
    %c0_i32_0 = arith.constant 0 : i32
    return %c0_i32, %arg0 : i32, i32
  }
  func.func @transform_4(%arg0: i32, %arg1: i32) -> (i32, i32, i32) {
    %c0_i32 = arith.constant 0 : i32
    %c0_i32_0 = arith.constant 0 : i32
    return %arg1, %c0_i32, %arg0 : i32, i32, i32
  }
  func.func @transform_5(%arg0: i32, %arg1: i32) -> (i32, i32, i32) {
    %c0_i32 = arith.constant 0 : i32
    %c0_i32_0 = arith.constant 0 : i32
    return %arg1, %c0_i32, %arg0 : i32, i32, i32
  }
}

</mosaic_0001>

<bundles_post_ra>
// kernel: tpu_custom_call.1
= control target key start
LH: loop header
LB: loop body
LE: loop exit
PB: predicated region body
PF: predicated region fallthrough
CT: control target
= control target key end

     0   :  { %s1707_s0 = inlined_call_operand.hbm [shape: f32[2,80,128], index: 0, kind: input, shape index: {}]   ;;  %s1708_s1 = inlined_call_operand.vmem [shape: f32[2,1,128], index: 1, kind: input, shape index: {}]   ;;  %s1709_s2 = inlined_call_operand.hbm [shape: f32[2,4,128], index: 2, kind: input, shape index: {}]   ;;  %s1710_s3 = inlined_call_operand.vmem [shape: f32[2,128], index: 3, kind: input, shape index: {}]   ;;  %s1711_s4 = inlined_call_operand.hbm [shape: f32[2,80,128], index: 4, kind: output, shape index: {0}]   ;;  %s1712_s5 = inlined_call_operand.hbm [shape: f32[2,4,128], index: 5, kind: output, shape index: {1}]  }
   0x1   :  { %1715 = sst [smem:[#allocation14_spill]] %s1707_s0 }
   0x2   :  { %11 = vsyncpa [#allocation3], 0 }
   0x3   :  { %13 = vsyncpa [#allocation3 + $0x1], 0 }
   0x4   :  { %14 = vsyncpa [#allocation6], 0 }
   0x5   :  { %16 = vsyncpa [#allocation6 + $0x1], 0 }
   0x6   :  { %17 = vsyncpa [#allocation4], 0 }
   0x7   :  { %19 = vsyncpa [#allocation4 + $0x1], 0 }
   0x8   :  { %20 = vsyncpa [#allocation9], 0 }
   0x9   :  { %22 = vsyncpa [#allocation9 + $0x1], 0  ;;  %s1173_s18 = smov 0   ;;  %s1175_s19 = smov 0  }
   0xa   :  { %s1177_s20 = smov 0   ;;  %s1179_s21 = smov 0  }
   0xb   :  { %s1181_s22 = smov 0   ;;  %s1183_s23 = smov 0  }
   0xc LB: > { %s784_s24 = sadd.s32 4294967295, %s1133_s23   ;;  %s785_s25 = sadd.s32 4294967294, %s1133_s23   ;;  %s1133_s23 = sphi %s1183_s23, %s28_s23   ;;  %s1129_s22 = sphi %s1181_s22, %s1756_s22   ;;  %s1125_s21 = sphi %s1179_s21, %s1755_s21   ;;  %s1121_s20 = sphi %s1177_s20, %s1754_s20   ;;  %s1117_s19 = sphi %s1175_s19, %s1753_s19   ;;  %s1113_s18 = sphi %s1173_s18, %s1752_s18  }
   0xd   : > { %s37_s26 = sadd.s32 1, %s1129_s22  ;;  %s49_s27 = sadd.s32 1, %s1121_s20 }
   0xe   : > { %p38_p0 = scmp.ge.s32.totalorder %s37_s26, 2  ;;  %p56_p1 = scmp.ne.s32.totalorder %s1121_s20, %s1117_s19 }
   0xf   : > { %p57_p2 = scmp.eq.s32.totalorder %s1133_s23, 0  ;;  %p62_p3 = scmp.ne.s32.totalorder %s1117_s19, %s1113_s18 }
  0x10   : > { %s1758_s26 = smov (%p38_p0, %s37_s26), 0  ;;  %p63_p5 = scmp.eq.s32.totalorder %s784_s24, 0 }
  0x11   : > { %p1214_p4 = por %p57_p2, %p56_p1  ;;  %s44_s29 = ssub.s32 %s1129_s22, %s1758_s26 }
  0x12   : > { %p170_p6 = scmp.eq.s32.totalorder %s784_s24, 1  ;;  %p47_p7 = scmp.eq.s32.totalorder %s44_s29, 0 }
  0x13   : > { %p1220_p8 = por %p63_p5, %p62_p3  ;;  %p176_p10 = scmp.eq.s32.totalorder %s785_s25, 1 }
  0x14   : > { %p1224_p9 = por %p170_p6, %p56_p1  ;;  %p837_p13 = scmp.lt.s32.totalorder %s1133_s23, 2 }
  0x15   : > { %s1717_s30 = scalar_select %p1220_p8, 1, 0 }
  0x16   : > { %s1718_s6 = scalar_select %p1224_p9, 1, 0 }
  0x17   : > { %s1229_s7 = scalar_select %p47_p7, %s1121_s20, %s49_s27  }
  0x18   : > { %p1231_p11 = por %p176_p10, %p62_p3  ;;  %s1238_s9 = sand.u32 1, %s1121_s20  }
  0x19   : > { %s811_s10 = smul.u32 80, %s1238_s9  ;;  %p1244_p0 = pnand %p837_p13, %p1214_p4 }
  0x1a   : > { %s1719_s8 = scalar_select %p1231_p11, 1, 0 }
  0x1b   : > { %s812_s11 = smul.u32 1280, %s1129_s22  ;;  %s1721_s0 = sld [smem:[#allocation14_spill]] }
  0x1c   : > { %s235_s16 = scalar_lea.vmem [#allocation2], %s811_s10  ;;  %s232_s24 = scalar_lea.sflag [#allocation3], %s1238_s9 }
  0x1d   : > { %s243_s17 = sshll.u32 %s235_s16, 4  ;;  %p957_p3 = pneg %p1244_p0  ;;  %s1253_s17 = int_to_ptr.vmem [resolvable:$true] %s243_s17 }
  0x21   : > { %s1251_s15 = scalar_lea.hbm %s1721_s0, %s812_s11  ;;  %s960_s29 = scalar_lea.hbm %s1721_s0, 2560 }
  0x22   : > { %s955_s25 = scalar_lea.hbm %s1251_s15, 1280  ;;  %p961_p6 = scmp.lt.u32.totalorder %s1251_s15, %s1721_s0 }
  0x23   : > { %p956_p2 = scmp.ne.s32.totalorder %s1251_s15, %s955_s25  ;;  %p962_p7 = scmp.lt.u32.totalorder %s960_s29, %s955_s25 }
  0x24   : > { %p964_p13 = scmp.lt.u32.totalorder %s955_s25, %s1251_s15 }
  0x25   : > { %p958_p4 = pnand %p957_p3, %p956_p2  ;;  %p963_p10 = por %p962_p7, %p961_p6 }
  0x27   : > { %p959_p5 = pneg %p958_p4  ;;  %p965_p12 = por %p964_p13, %p963_p10 }
  0x29   : > { %p966_p1 = pnand %p965_p12, %p959_p5 }
  0x2b   : > { %969 = shalt.err (!%p966_p1)
}
  0x2c   : > { %s970_s10 = scalar_lea.vmem %s1253_s17, 1280  ;;  %s1135_s14 = smov [#allocation2]  }
  0x2d   : > { %p971_p2 = scmp.ne.s32.totalorder %s1253_s17, %s970_s10  ;;  %s975_s16 = sshll.u32 %s1135_s14, 4  ;;  %s976_s16 = int_to_ptr.vmem [resolvable:$false] %s975_s16 }
  0x2e   : > { %s977_s27 = scalar_lea.vmem %s976_s16, 2560  ;;  %p978_p9 = scmp.lt.s32.totalorder %s1253_s17, %s976_s16 }
  0x2f   : > { %p973_p4 = pnand %p971_p2, %p957_p3  ;;  %p979_p6 = scmp.lt.s32.totalorder %s977_s27, %s970_s10 }
  0x31   : > { %p974_p11 = pneg %p973_p4  ;;  %p980_p7 = por %p979_p6, %p978_p9 }
  0x33   : > { %p981_p10 = pnand %p980_p7, %p974_p11 }
  0x35   : > { %984 = shalt.err (!%p981_p10)
}
  0x36   : > { %s1136_s25 = smov 128   ;;  %s1137_s28 = smov 8  }
  0x37   : > { %826 = dma.hbm_to_vmem [thread:$0]  (!%p1244_p0), %s1251_s15, 1280, %s1253_s17, %s232_s24, %s1136_s25, %s1136_s25, %s1137_s28  }
  0x38   : > { %p279_p12 = scmp.lt.s32.totalorder %s1133_s23, 3  ;;  %s790_s29 = sshll.u32 %s1238_s9, 2 }
  0x39   : > { %s791_s11 = sshll.u32 %s1129_s22, 6  ;;  %p1722_p9 = scmp.ge.s32.totalorder %s1133_s23, 1 }
  0x3a   : > { %s1296_s16 = scalar_lea.hbm %s1709_s2, %s791_s11  ;;  %s266_s27 = scalar_lea.vmem [#allocation5], %s790_s29 }
  0x3b   : > { %p1289_p11 = pnand %p1722_p9, %p279_p12  ;;  %s274_s0 = sshll.u32 %s266_s27, 4  ;;  %s275_s0 = int_to_ptr.vmem [resolvable:$true] %s274_s0 }
  0x3c   : > { %s263_s15 = scalar_lea.sflag [#allocation6], %s1238_s9  ;;  %s985_s17 = scalar_lea.hbm %s1296_s16, 64 }
  0x3d   : > { %s1723_s13 = scalar_select %p1289_p11, 1, 0 }
  0x3e   : > { %p986_p1 = scmp.ne.s32.totalorder %s1296_s16, %s985_s17  ;;  %s990_s28 = scalar_lea.hbm %s1709_s2, 128 }
  0x3f   : > { %p991_p2 = scmp.lt.u32.totalorder %s1296_s16, %s1709_s2  ;;  %p992_p4 = scmp.lt.u32.totalorder %s990_s28, %s985_s17 }
  0x40   : > { %p988_p5 = pnand %p986_p1, %p957_p3  ;;  %p994_p7 = scmp.lt.u32.totalorder %s985_s17, %s1296_s16 }
  0x41   : > { %p993_p6 = por %p992_p4, %p991_p2 }
  0x42   : > { %p989_p13 = pneg %p988_p5 }
  0x43   : > { %p995_p10 = por %p994_p7, %p993_p6 }
  0x45   : > { %p996_p12 = pnand %p995_p10, %p989_p13 }
  0x47   : > { %999 = shalt.err (!%p996_p12)
}
  0x48   : > { %s1000_s9 = scalar_lea.vmem %s275_s0, 64  ;;  %s1138_s29 = smov [#allocation5]  }
  0x49   : > { %p1001_p9 = scmp.ne.s32.totalorder %s275_s0, %s1000_s9  ;;  %s1005_s14 = sshll.u32 %s1138_s29, 4  ;;  %s1006_s14 = int_to_ptr.vmem [resolvable:$false] %s1005_s14 }
  0x4a   : > { %s1007_s27 = scalar_lea.vmem %s1006_s14, 128  ;;  %p1008_p8 = scmp.lt.s32.totalorder %s275_s0, %s1006_s14 }
  0x4b   : > { %p1003_p1 = pnand %p1001_p9, %p957_p3  ;;  %p1009_p11 = scmp.lt.s32.totalorder %s1007_s27, %s1000_s9 }
  0x4d   : > { %p1004_p5 = pneg %p1003_p1  ;;  %p1010_p2 = por %p1009_p11, %p1008_p8 }
  0x4f   : > { %p1011_p4 = pnand %p1010_p2, %p1004_p5 }
  0x51   : > { %1014 = shalt.err (!%p1011_p4)
}
  0x52   : > { %829 = dma.hbm_to_vmem [thread:$0]  (!%p1244_p0), %s1296_s16, 64, %s275_s0, %s263_s15  }
  0x53   : > { %p1724_p13 = scmp.ne.s32.totalorder %s1723_s13, 0 }
  0x54   : > { %s1321_s17 = sand.u32 (!%p1724_p13), 1, %s1117_s19   ;;  %p1725_p8 = scmp.ne.s32.totalorder (!%p1724_p13), %s1717_s30, 0 }
  0x55   : > { %283 = sbr.rel (%p1724_p13) target bundleno = 186 (0xba), region = 36  ;;  %s286_s25 = scalar_lea.sflag (!%p1724_p13), [#allocation3], %s1321_s17 }
  0x56   : > { %s813_s24 = smul.u32 (!%p1724_p13), 80, %s1321_s17 }
  0x58   : > { %s1327_s28 = scalar_lea.vmem (!%p1724_p13), [#allocation2], %s813_s24 }
  0x5c   : > { %1096 = dma.done.wait (%p1725_p8), %s286_s25, 1280  }
  0x5d   : > { %1098 = vsyncadd (%p1725_p8), %s286_s25, 4294966016  ;;  %s793_s0 = sshll.u32 %s1321_s17, 2  ;;  %s295_s12 = scalar_lea.sflag [#allocation6], %s1321_s17 }
  0x5e   : > { %s298_s13 = scalar_lea.vmem [#allocation5], %s793_s0 }
  0x5f   : > { %1100 = dma.done.wait (%p1725_p8), %s295_s12, 64  }
  0x60   : > { %1102 = vsyncadd (%p1725_p8), %s295_s12, 4294967232  ;;  %p345_p0 = scmp.lt.s32.totalorder %s1125_s21, 1  ;;  %v355_v0 = vld [vmem:[%s1327_s28] sm:$0xff]  ;;  %v356_v2 = vld [vmem:[%s1327_s28 + $0x8] sm:$0xff]  ;;  %s344_s29 = scalar_lea.vmem [#allocation8], %s793_s0  ;;  %vm576_vm0 = vcmask 1041408   ;;  %v369_v36 = vlaneseq }
  0x61   : > { %v795_v3 = vmul.f32 -1.442695, %v355_v0  ;;  %v796_v5 = vmul.f32 -1.442695, %v356_v2  ;;  %v357_v6 = vld [vmem:[%s1327_s28 + $0x10] sm:$0xff]  ;;  %v358_v7 = vld [vmem:[%s1327_s28 + $0x18] sm:$0xff] }
  0x62   : > { %s346_s16 = scalar_select %p345_p0, %s1125_s21, 1  ;;  %v359_v8 = vld [vmem:[%s1327_s28 + $0x20] sm:$0xff]  ;;  %v797_v9 = vmul.f32 -1.442695, %v357_v6  ;;  %v798_v10 = vmul.f32 -1.442695, %v358_v7 }
  0x63   : > { %891 = vpow2.f32 %v795_v3  ;;  %v799_v11 = vmul.f32 -1.442695, %v359_v8  ;;  %v360_v12 = vld [vmem:[%s1327_s28 + $0x28] sm:$0xff]  ;;  %v361_v13 = vld [vmem:[%s1327_s28 + $0x30] sm:$0xff]  ;;  %v362_v14 = vld [vmem:[%s1327_s28 + $0x38] sm:$0xff]  ;;  %s618_s14 = sshll.u32 %s344_s29, 4  ;;  %s1362_s14 = int_to_ptr.vmem [resolvable:$true] %s618_s14 }
  0x64   : > { %s350_s10 = scalar_lea.vmem %s1708_s1, %s346_s16  ;;  %v800_v15 = vmul.f32 -1.442695, %v360_v12  ;;  %v801_v16 = vmul.f32 -1.442695, %v361_v13  ;;  %v363_v17 = vld [vmem:[%s1327_s28 + $0x40] sm:$0xff]  ;;  %v364_v18 = vld [vmem:[%s1327_s28 + $0x48] sm:$0xff] }
  0x65   : > { %v365_v1 = vld [vmem:[%s350_s10] sm:$0x1]  ;;  %v802_v20 = vmul.f32 -1.442695, %v362_v14  ;;  %v803_v22 = vmul.f32 -1.442695, %v363_v17 }
  0x66   : > { %v805_v4 = vmul.f32 -1.442695, %v365_v1  ;;  %v366_v19 = vld [vmem:[%s298_s13] sm:$0xf]  ;;  %v804_v24 = vmul.f32 -1.442695, %v364_v18 }
  0x67   : > { %v367_v21 = vld [vmem:[%s1710_s3] sm:$0x3]  ;;  %v570_v23 = vrot.slane %v366_v19, 2  ;;  %s808_s27 = sshll.u32 %s1125_s21, 6  ;;  %vm578_vm1 = vcmask 1042432   ;;  %s587_s12 = scalar_lea.sflag [#allocation9], %s1321_s17 }
  0x68   : > { %893 = vpow2.f32 %v805_v4  ;;  %v568_v25 = vsub.f32 %v367_v21, %v366_v19  ;;  %s1367_s0 = scalar_lea.hbm %s1712_s5, %s808_s27  ;;  %s1015_s13 = scalar_lea.vmem %s1362_s14, 64 }
  0x69   : > { %895 = vpow2.f32 %v796_v5  ;;  %v572_v26 = vadd.f32 %v570_v23, %v367_v21  ;;  %p1016_p3 = scmp.ne.s32.totalorder %s1362_s14, %s1015_s13  ;;  %p1726_p11 = scmp.ne.s32.totalorder %s1718_s6, 0 }
  0x6a   : > { %897 = vpow2.f32 %v797_v9  ;;  %s1139_s16 = smov [#allocation8]  }
  0x6b   : > { %899 = vpow2.f32 %v798_v10  ;;  %v574_v27 = vrot.slane %v572_v26, 6  ;;  %p1017_p6 = pnand %p1016_p3, %p1726_p11  ;;  %s1019_s15 = sshll.u32 %s1139_s16, 4  ;;  %s1020_s15 = int_to_ptr.vmem [resolvable:$false] %s1019_s15 }
  0x6c   : > { %901 = vpow2.f32 %v799_v11  ;;  %s1021_s11 = scalar_lea.vmem %s1020_s15, 128  ;;  %p1022_p10 = scmp.lt.s32.totalorder %s1362_s14, %s1020_s15 }
  0x6d   : > { %903 = vpow2.f32 %v800_v15  ;;  %v892_v28 = vpop.eup %891  ;;  %v577_v31 = vsel %vm576_vm0, %v568_v25, %v574_v27  ;;  %p1018_p7 = pneg %p1017_p6  ;;  %p1023_p12 = scmp.lt.s32.totalorder %s1021_s11, %s1015_s13 }
  0x6e   : > { %905 = vpow2.f32 %v801_v16  ;;  %v404_v30 = vadd.f32 1.0, %v892_v28  ;;  %v579_v34 = vsel %vm578_vm1, %v577_v31, %v574_v27 }
  0x6f   : > { %907 = vpow2.f32 %v802_v20  ;;  %580 = vst [vmem:[%s344_s29] sm:$0xf] %v579_v34  ;;  %p1024_p9 = por %p1023_p12, %p1022_p10 }
  0x70   : > { %909 = vpow2.f32 %v803_v22 }
  0x71   : > { %911 = vpow2.f32 %v804_v24  ;;  %p1025_p1 = pnand %p1024_p9, %p1018_p7 }
  0x72   : > { %v894_v29 = vpop.eup %893  ;;  %913 = vrcp.f32 %v404_v30 }
  0x73   : > { %v896_v32 = vpop.eup %895  ;;  %v437_v33 = vadd.f32 1.0, %v894_v29 }
  0x74   : > { %v898_v35 = vpop.eup %897  ;;  %v405_v37 = vadd.f32 1.0, %v896_v32 }
  0x75   : > { %v900_v38 = vpop.eup %899  ;;  %915 = vrcp.f32 %v437_v33  ;;  %v406_v39 = vadd.f32 1.0, %v898_v35 }
  0x76   : > { %1028 = shalt.err (!%p1025_p1)
}
  0x77   : > { %s1029_s10 = scalar_lea.hbm %s1367_s0, 64  ;;  %s1033_s29 = scalar_lea.hbm %s1712_s5, 128 }
  0x78   : > { %p1030_p5 = scmp.ne.s32.totalorder %s1367_s0, %s1029_s10  ;;  %p1034_p13 = scmp.lt.u32.totalorder %s1367_s0, %s1712_s5 }
  0x79   : > { %p1035_p8 = scmp.lt.u32.totalorder %s1033_s29, %s1029_s10  ;;  %p1037_p3 = scmp.lt.u32.totalorder %s1029_s10, %s1367_s0 }
  0x7a   : > { %p1031_p2 = pnand %p1030_p5, %p1726_p11 }
  0x7b   : > { %p1036_p0 = por %p1035_p8, %p1034_p13 }
  0x7c   : > { %p1032_p4 = pneg %p1031_p2 }
  0x7d   : > { %p1038_p6 = por %p1037_p3, %p1036_p0 }
  0x7f   : > { %p1039_p7 = pnand %p1038_p6, %p1032_p4 }
  0x81   : > { %1042 = shalt.err (!%p1039_p7)
}
  0x82   : > { %820 = dma.vmem_to_hbm [thread:$0]  (%p1726_p11), %s1362_s14, 64, %s1367_s0, %s587_s12   ;;  %v902_v40 = vpop.eup %901  ;;  %917 = vrcp.f32 %v405_v37  ;;  %v407_v41 = vadd.f32 1.0, %v900_v38  ;;  %v442_v45 = vshrl.u32 %v369_v36, 7  ;;  %v1399_v61 = vand.u32 127, %v369_v36 }
  0x83   : > { %v904_v42 = vpop.eup %903  ;;  %919 = vrcp.f32 %v406_v39  ;;  %v408_v43 = vadd.f32 1.0, %v902_v40  ;;  %s1533_s14 = scalar_lea.vmem [#allocation7], %s813_s24  ;;  %s814_s28 = smul.u32 1280, %s1125_s21 }
  0x84   : > { %v906_v44 = vpop.eup %905  ;;  %921 = vrcp.f32 %v407_v41  ;;  %v409_v46 = vadd.f32 1.0, %v904_v42  ;;  %v443_v52 = vsub.s32 0, %v442_v45  ;;  %vm373_vm2 = vcmp.lt.s32.totalorder %v1399_v61, 80  ;;  %s601_s24 = sshll.u32 %s1533_s14, 4  ;;  %s582_s13 = scalar_lea.sflag [#allocation4], %s1321_s17  ;;  %s1638_s24 = int_to_ptr.vmem [resolvable:$true] %s601_s24 }
  0x85   : > { %v908_v47 = vpop.eup %907  ;;  %923 = vrcp.f32 %v408_v43  ;;  %v410_v48 = vadd.f32 1.0, %v906_v44  ;;  %s1656_s12 = scalar_lea.hbm %s1711_s4, %s814_s28  ;;  %s1043_s16 = scalar_lea.vmem %s1638_s24, 1280 }
  0x86   : > { %v910_v49 = vpop.eup %909  ;;  %925 = vrcp.f32 %v409_v46  ;;  %v411_v50 = vadd.f32 1.0, %v908_v47  ;;  %p1044_p10 = scmp.ne.s32.totalorder %s1638_s24, %s1043_s16  ;;  %s1140_s15 = smov [#allocation7]  }
  0x87   : > { %v912_v51 = vpop.eup %911  ;;  %927 = vrcp.f32 %v410_v48  ;;  %v412_v53 = vadd.f32 1.0, %v910_v49  ;;  %s1047_s11 = sshll.u32 %s1140_s15, 4  ;;  %s1048_s11 = int_to_ptr.vmem [resolvable:$false] %s1047_s11 }
  0x88   : > { %929 = vrcp.f32 %v411_v50  ;;  %v413_v54 = vadd.f32 1.0, %v912_v51  ;;  %v914_v55 = vpop.eup %913  ;;  %p1045_p12 = pnand %p1044_p10, %p1726_p11  ;;  %s1049_s10 = scalar_lea.vmem %s1048_s11, 2560 }
  0x89   : > { %v916_v56 = vpop.eup %915  ;;  %931 = vrcp.f32 %v412_v53  ;;  %vm526_vm3 = vcmp.gt.f32.partialorder %v914_v55, 0.3  ;;  %p1050_p1 = scmp.lt.s32.totalorder %s1638_s24, %s1048_s11  ;;  %p1051_p5 = scmp.lt.s32.totalorder %s1049_s10, %s1043_s16 }
  0x8a   : > { %v444_v58 = vrot.slane %v916_v56, %v443_v52  ;;  %933 = vrcp.f32 %v413_v54  ;;  %vm1478_vm7 = vmand %vm526_vm3, %vm373_vm2  ;;  %p1046_p9 = pneg %p1045_p12 }
  0x8b   : > { %p1052_p2 = por %p1051_p5, %p1050_p1 }
  0x8c   : > { %v1392_v57 = vpop.eup %917  ;;  %v1401_v62 = vmul.f32 %v914_v55, %v444_v58 }
  0x8d   : > { %v1394_v59 = vpop.eup %919  ;;  %v1404_v63 = vmul.f32 %v1392_v57, %v444_v58  ;;  %vm527_vm4 = vcmp.gt.f32.partialorder %v1392_v57, 0.3  ;;  %p1053_p4 = pnand %p1052_p2, %p1046_p9 }
  0x8e   : > { %v1396_v60 = vpop.eup %921  ;;  %v1407_v0 = vmul.f32 %v1394_v59, %v444_v58  ;;  %935 = vrsqrt.f32 %v1401_v62  ;;  %vm528_vm5 = vcmp.gt.f32.partialorder %v1394_v59, 0.3  ;;  %vm458_vm6 = vcmp.eq.f32.partialorder %v1401_v62, inf  ;;  %vm1493_vm3 = vmand %vm527_vm4, %vm373_vm2 }
  0x8f   : > { %v1409_v1 = vpop.eup %923  ;;  %v1412_v2 = vmul.f32 %v1396_v60, %v444_v58  ;;  %937 = vrsqrt.f32 %v1404_v63  ;;  %vm460_vm8 = vcmp.eq.f32.partialorder %v1401_v62, 0.0  ;;  %v461_v8 = vand.u32 2147483648, %v1401_v62  ;;  %vm1509_vm4 = vmand %vm528_vm5, %vm373_vm2 }
  0x90   : > { %v1414_v3 = vpop.eup %925  ;;  %939 = vrsqrt.f32 %v1407_v0  ;;  %v1430_v6 = vmul.f32 %v1409_v1, %v444_v58  ;;  %vm465_vm9 = vcmp.eq.f32.partialorder %v1404_v63, inf  ;;  %vm467_vm10 = vcmp.eq.f32.partialorder %v1404_v63, 0.0 }
  0x91   : > { %v1417_v4 = vpop.eup %927  ;;  %941 = vrsqrt.f32 %v1412_v2  ;;  %v1433_v7 = vmul.f32 %v1414_v3, %v444_v58  ;;  %v468_v12 = vand.u32 2147483648, %v1404_v63  ;;  %vm472_vm11 = vcmp.eq.f32.partialorder %v1407_v0, inf }
  0x92   : > { %v1420_v5 = vpop.eup %929  ;;  %v1438_v9 = vmul.f32 %v1417_v4, %v444_v58  ;;  %943 = vrsqrt.f32 %v1430_v6  ;;  %v475_v14 = vand.u32 2147483648, %v1407_v0  ;;  %vm479_vm13 = vcmp.eq.f32.partialorder %v1412_v2, inf }
  0x93   : > { %v1441_v10 = vmul.f32 %v1420_v5, %v444_v58  ;;  %v1443_v11 = vpop.eup %931  ;;  %945 = vrsqrt.f32 %v1433_v7  ;;  %vm481_vm14 = vcmp.eq.f32.partialorder %v1412_v2, 0.0  ;;  %v482_v15 = vand.u32 2147483648, %v1412_v2 }
  0x94   : > { %v1449_v13 = vpop.eup %933  ;;  %947 = vrsqrt.f32 %v1438_v9  ;;  %vm530_vm15 = vcmp.gt.f32.partialorder %v1409_v1, 0.3  ;;  %v1466_v17 = vmul.f32 %v1443_v11, %v444_v58  ;;  %vm488_vm0 = vcmp.eq.f32.partialorder %v1430_v6, 0.0 }
  0x95   : > { %949 = vrsqrt.f32 %v1441_v10  ;;  %v1469_v18 = vmul.f32 %v1449_v13, %v444_v58  ;;  %v489_v21 = vand.u32 2147483648, %v1430_v6  ;;  %vm493_vm1 = vcmp.eq.f32.partialorder %v1433_v7, inf }
  0x96   : > { %v496_v25 = vand.u32 2147483648, %v1433_v7  ;;  %951 = vrsqrt.f32 %v1466_v17  ;;  %vm500_vm12 = vcmp.eq.f32.partialorder %v1438_v9, inf  ;;  %vm1733_vm5 = vcmp.gt.f32.partialorder %v1396_v60, 0.3 }
  0x97   : > { %953 = vrsqrt.f32 %v1469_v18  ;;  %v503_v38 = vand.u32 2147483648, %v1438_v9  ;;  %v510_v51 = vand.u32 2147483648, %v1441_v10  ;;  %v517_v1 = vand.u32 2147483648, %v1466_v17 }
  0x98   : > { %v936_v16 = vpop.eup %935 }
  0x99   : > { %v938_v19 = vpop.eup %937  ;;  %v457_v20 = vmul.f32 %v936_v16, %v1401_v62 }
  0x9a   : > { %v940_v22 = vpop.eup %939  ;;  %v464_v24 = vmul.f32 %v938_v19, %v1404_v63 }
  0x9b   : > { %v942_v26 = vpop.eup %941  ;;  %v459_v27 = vsel %vm458_vm6, %v1401_v62, %v457_v20  ;;  %v471_v29 = vmul.f32 %v940_v22, %v1407_v0  ;;  %vm502_vm6 = vcmp.eq.f32.partialorder %v1438_v9, 0.0 }
  0x9c   : > { %v462_v30 = vsel %vm460_vm8, %v461_v8, %v459_v27  ;;  %v466_v31 = vsel %vm465_vm9, %v1404_v63, %v464_v24  ;;  %v478_v33 = vmul.f32 %v942_v26, %v1412_v2  ;;  %vm1526_vm8 = vmand %vm1733_vm5, %vm373_vm2  ;;  %v944_v39 = vpop.eup %943  ;;  %vm507_vm9 = vcmp.eq.f32.partialorder %v1441_v10, inf }
  0x9d   : > { %v548_v34 = vsel %vm1478_vm7, %v462_v30, -1.0  ;;  %v469_v35 = vsel %vm467_vm10, %v468_v12, %v466_v31  ;;  %v473_v36 = vsel %vm472_vm11, %v1407_v0, %v471_v29  ;;  %vm1736_vm7 = vcmp.eq.f32.partialorder %v1407_v0, 0.0  ;;  %v946_v43 = vpop.eup %945  ;;  %vm1558_vm11 = vmand %vm530_vm15, %vm373_vm2 }
  0x9e   : > { %558 = vst [vmem:[%s1533_s14] sm:$0xff] %v548_v34  ;;  %v549_v40 = vsel %vm1493_vm3, %v469_v35, -1.0  ;;  %v476_v41 = vsel %vm1736_vm7, %v475_v14, %v473_v36  ;;  %v480_v42 = vsel %vm479_vm13, %v1412_v2, %v478_v33  ;;  %v485_v46 = vmul.f32 %v944_v39, %v1430_v6  ;;  %v948_v47 = vpop.eup %947 }
  0x9f   : > { %559 = vst [vmem:[%s1533_s14 + $0x8] sm:$0xff] %v549_v40  ;;  %v550_v44 = vsel %vm1509_vm4, %v476_v41, -1.0  ;;  %v483_v45 = vsel %vm481_vm14, %v482_v15, %v480_v42  ;;  %vm509_vm10 = vcmp.eq.f32.partialorder %v1441_v10, 0.0  ;;  %v492_v50 = vmul.f32 %v946_v43, %v1433_v7  ;;  %v950_v52 = vpop.eup %949 }
  0xa0   : > { %560 = vst [vmem:[%s1533_s14 + $0x10] sm:$0xff] %v550_v44  ;;  %v551_v48 = vsel %vm1526_vm8, %v483_v45, -1.0  ;;  %vm534_vm13 = vcmp.gt.f32.partialorder %v1443_v11, 0.3  ;;  %vm1739_vm14 = vcmp.eq.f32.partialorder %v1430_v6, inf  ;;  %v499_v55 = vmul.f32 %v948_v47, %v1438_v9  ;;  %v952_v2 = vpop.eup %951 }
  0xa1   : > { %561 = vst [vmem:[%s1533_s14 + $0x18] sm:$0xff] %v551_v48  ;;  %v487_v53 = vsel %vm1739_vm14, %v1430_v6, %v485_v46  ;;  %vm1740_vm3 = vcmp.gt.f32.partialorder %v1414_v3, 0.3  ;;  %vm514_vm4 = vcmp.eq.f32.partialorder %v1466_v17, inf  ;;  %vm535_vm5 = vcmp.gt.f32.partialorder %v1449_v13, 0.3  ;;  %v954_v6 = vpop.eup %953 }
  0xa2   : > { %vm1573_vm15 = vmand %vm1740_vm3, %vm373_vm2  ;;  %v490_v56 = vsel %vm488_vm0, %v489_v21, %v487_v53  ;;  %v494_v57 = vsel %vm493_vm1, %v1433_v7, %v492_v50  ;;  %vm1743_vm8 = vcmp.gt.f32.partialorder %v1417_v4, 0.3  ;;  %v506_v59 = vmul.f32 %v950_v52, %v1441_v10 }
  0xa3   : > { %vm1589_vm7 = vmand %vm1743_vm8, %vm373_vm2  ;;  %vm516_vm14 = vcmp.eq.f32.partialorder %v1466_v17, 0.0  ;;  %v552_v60 = vsel %vm1558_vm11, %v490_v56, -1.0  ;;  %vm1746_vm0 = vcmp.eq.f32.partialorder %v1433_v7, 0.0  ;;  %v501_v63 = vsel %vm500_vm12, %v1438_v9, %v499_v55 }
  0xa4   : > { %v497_v62 = vsel %vm1746_vm0, %v496_v25, %v494_v57  ;;  %vm1747_vm1 = vcmp.gt.f32.partialorder %v1420_v5, 0.3  ;;  %562 = vst [vmem:[%s1533_s14 + $0x20] sm:$0xff] %v552_v60  ;;  %v504_v4 = vsel %vm502_vm6, %v503_v38, %v501_v63  ;;  %v508_v5 = vsel %vm507_vm9, %v1441_v10, %v506_v59  ;;  %vm546_vm6 = vmand %vm534_vm13, %vm373_vm2 }
  0xa5   : > { %vm1606_vm3 = vmand %vm1747_vm1, %vm373_vm2  ;;  %v553_v3 = vsel %vm1573_vm15, %v497_v62, -1.0  ;;  %vm521_vm12 = vcmp.eq.f32.partialorder %v1469_v18, inf  ;;  %v554_v7 = vsel %vm1589_vm7, %v504_v4, -1.0  ;;  %v511_v8 = vsel %vm509_vm10, %v510_v51, %v508_v5 }
  0xa6   : > { %563 = vst [vmem:[%s1533_s14 + $0x28] sm:$0xff] %v553_v3  ;;  %v513_v12 = vmul.f32 %v952_v2, %v1466_v17  ;;  %v524_v9 = vand.u32 2147483648, %v1469_v18  ;;  %564 = vst [vmem:[%s1533_s14 + $0x30] sm:$0xff] %v554_v7  ;;  %v555_v14 = vsel %vm1606_vm3, %v511_v8, -1.0  ;;  %v520_v10 = vmul.f32 %v954_v6, %v1469_v18 }
  0xa7   : > { %vm523_vm9 = vcmp.eq.f32.partialorder %v1469_v18, 0.0  ;;  %565 = vst [vmem:[%s1533_s14 + $0x38] sm:$0xff] %v555_v14  ;;  %vm547_vm10 = vmand %vm535_vm5, %vm373_vm2 }
  0xa8   : > { %v515_v15 = vsel %vm514_vm4, %v1466_v17, %v513_v12  ;;  %v522_v16 = vsel %vm521_vm12, %v1469_v18, %v520_v10 }
  0xa9   : > { %v518_v11 = vsel %vm516_vm14, %v517_v1, %v515_v15  ;;  %v525_v20 = vsel %vm523_vm9, %v524_v9, %v522_v16 }
  0xaa   : > { %v556_v19 = vsel %vm546_vm6, %v518_v11, -1.0  ;;  %v557_v61 = vsel %vm547_vm10, %v525_v20, -1.0 }
  0xab   : > { %566 = vst [vmem:[%s1533_s14 + $0x40] sm:$0xff] %v556_v19  ;;  %567 = vst [vmem:[%s1533_s14 + $0x48] sm:$0xff] %v557_v61 }
  0xac   : > { %1056 = shalt.err (!%p1053_p4)
}
  0xad   : > { %s1057_s30 = scalar_lea.hbm %s1656_s12, 1280  ;;  %s1061_s27 = scalar_lea.hbm %s1711_s4, 2560 }
  0xae   : > { %p1058_p13 = scmp.ne.s32.totalorder %s1656_s12, %s1057_s30  ;;  %p1062_p3 = scmp.lt.u32.totalorder %s1656_s12, %s1711_s4 }
  0xaf   : > { %p1063_p6 = scmp.lt.u32.totalorder %s1061_s27, %s1057_s30  ;;  %p1065_p10 = scmp.lt.u32.totalorder %s1057_s30, %s1656_s12 }
  0xb0   : > { %p1059_p8 = pnand %p1058_p13, %p1726_p11 }
  0xb1   : > { %p1064_p7 = por %p1063_p6, %p1062_p3 }
  0xb2   : > { %p1060_p0 = pneg %p1059_p8 }
  0xb3   : > { %p1066_p12 = por %p1065_p10, %p1064_p7 }
  0xb5   : > { %p1067_p9 = pnand %p1066_p12, %p1060_p0 }
  0xb7   : > { %1070 = shalt.err (!%p1067_p9)
}
  0xb8   : > { %s1141_s28 = smov 128   ;;  %s1142_s21 = smov 8  }
  0xb9   : > { %819 = dma.vmem_to_hbm [thread:$0]  (%p1726_p11), %s1638_s24, 1280, %s1656_s12, %s582_s13, %s1141_s28, %s1141_s28, %s1142_s21  }
  0xba PF: > { %s630_s0 = sand.u32 1, %s1113_s18   ;;  %p1750_p1 = scmp.ne.s32.totalorder %s1719_s8, 0 }
  0xbb   : > { %p1751_p5 = scmp.ge.s32.totalorder %s1133_s23, 2  ;;  %s631_s16 = scalar_lea.sflag [#allocation4], %s630_s0 }
  0xbd   : > { %p831_p2 = pnand %p1751_p5, %p1750_p1 }
  0xbf   : > { %1104 = dma.done.wait (!%p831_p2), %s631_s16, 1280  }
  0xc0   : > { %1106 = vsyncadd (!%p831_p2), %s631_s16, 4294966016  ;;  %s640_s15 = scalar_lea.sflag [#allocation9], %s630_s0 }
  0xc1   : > { %1108 = dma.done.wait (!%p831_p2), %s640_s15, 64  }
  0xc2   : > { %1110 = vsyncadd (!%p831_p2), %s640_s15, 4294967232  ;;  %s28_s23 = sadd.s32 1, %s1133_s23   ;;  %s1752_s18 = smov %s1117_s19 }
  0xc3   : > { %p25_p4 = scmp.ge.s32.totalorder %s28_s23, 4   ;;  %s1753_s19 = smov %s1121_s20 }
  0xc4   : > { %s1754_s20 = smov %s1229_s7  ;;  %s1755_s21 = smov %s1129_s22 }
  0xc5   : > { %s1756_s22 = smov %s1758_s26  ;;  %27 = sbr.rel (!%p25_p4) target bundleno = 12 (0xc), region = 117 }
  0xcc   :  { %645 = vsyncpa [#allocation3], 1 }
  0xcd   :  { %647 = vsyncpa [#allocation3 + $0x1], 1 }
  0xce   :  { %648 = vsyncpa [#allocation6], 1 }
  0xcf   :  { %650 = vsyncpa [#allocation6 + $0x1], 1 }
  0xd0   :  { %651 = vsyncpa [#allocation4], 1 }
  0xd1   :  { %653 = vsyncpa [#allocation4 + $0x1], 1 }
  0xd2   :  { %654 = vsyncpa [#allocation9], 1 }
  0xd3   :  { %656 = vsyncpa [#allocation9 + $0x1], 1 }

</bundles_post_ra>
